<compile_context>
chip_gen: v7x
topology: tpu7x:2x2x1
jax: 0.10.0
libtpu: 0.0.40
codegen_flags: <defaults>
</compile_context>

<pallas_src>
import functools

import jax
import jax.numpy as jnp
from jax.experimental import pallas as pl
from jax.experimental.pallas import tpu as pltpu


def _mlp_fused_kernel(x_ref, w_stack_ref, b_stack_ref, w_out_ref, b_out_ref,
                      o_ref, *, n_hidden: int):
    """Fused forward pass of the whole MLP.

    x_ref       : (B, P)            padded input
    w_stack_ref : (n_hidden, P, P)  padded hidden-layer weights
    b_stack_ref : (n_hidden, 1, P)  padded hidden-layer biases
    w_out_ref   : (1, P)            padded output-layer weight (as a row)
    b_out_ref   : (1, 1)            output-layer bias
    o_ref       : (B, 1)            output
    """
    # Activations stay on-chip (vregs / compiler-managed VMEM) across layers.
    h = x_ref[...]
    for i in range(n_hidden):                       # statically unrolled
        y = jnp.dot(h, w_stack_ref[i], preferred_element_type=jnp.float32)
        h = jnp.maximum(y + b_stack_ref[i], 0.0)    # Linear -> ReLU (Dropout=id)

    # Output Linear (out_features=1): VPU multiply + lane reduction (XLU)
    # instead of a near-empty MXU pass.  Padded lanes of h and w_out are
    # exact zeros, so they contribute nothing.
    y = jnp.sum(h * w_out_ref[...], axis=-1, keepdims=True) + b_out_ref[...]
    o_ref[...] = y.astype(o_ref.dtype)


def _pad2(a, rows, cols):
    r, c = a.shape
    return jnp.pad(a, ((0, rows - r), (0, cols - c)))


def mlp_forward(x, hidden_params, out_params):
    """Single pallas_call running the entire MLP forward pass."""
    B, F = x.shape
    n_hidden = len(hidden_params)
    H = hidden_params[0][0].shape[1]

    # Lane-dense padded width (multiple of 128).
    P = 128 * pl.cdiv(max(F, H), 128)

    # Zero-pad (exact) and stack operands: 5 inputs total regardless of depth.
    x_pad = _pad2(x, B, P)
    w_stack = jnp.stack([_pad2(w, P, P) for (w, _) in hidden_params])
    b_stack = jnp.stack([_pad2(b, 1, P) for (_, b) in hidden_params])
    w_out, b_out = out_params                      # (H, 1), (1, 1)
    w_out_row = _pad2(w_out.reshape(1, -1), 1, P)  # (1, P)

    inputs = [x_pad, w_stack, b_stack, w_out_row, b_out]

    # Advisory cost estimate for XLA's scheduler.
    flops = n_hidden * (2 * B * P * P + 2 * B * P) + (2 * B * P + B)
    bytes_accessed = sum(a.size * a.dtype.itemsize for a in inputs)
    bytes_accessed += B * 1 * x.dtype.itemsize     # final output store

    kernel = functools.partial(_mlp_fused_kernel, n_hidden=n_hidden)
    return pl.pallas_call(
        kernel,
        out_shape=jax.ShapeDtypeStruct((B, 1), x.dtype),
        # Whole arrays in VMEM, no grid: single kernel invocation, no
        # pipeline prologue/epilogue or per-step DMA bookkeeping.
        in_specs=[pl.BlockSpec(memory_space=pltpu.MemorySpace.VMEM)
                  for _ in inputs],
        out_specs=pl.BlockSpec(memory_space=pltpu.MemorySpace.VMEM),
        cost_estimate=pl.CostEstimate(
            flops=flops, transcendentals=0, bytes_accessed=bytes_accessed),
    )(*inputs)


def init_mlp_params(key, input_layer_size, n_hidden_layers, hidden_layers_size):
    """Deterministic synthetic parameters (PyTorch init ranges, stored transposed)."""
    params = []
    in_dim = input_layer_size
    for _ in range(n_hidden_layers):
        key, kw, kb = jax.random.split(key, 3)
        bound = 1.0 / jnp.sqrt(in_dim)
        w = jax.random.uniform(kw, (in_dim, hidden_layers_size),
                               minval=-bound, maxval=bound, dtype=jnp.float32)
        b = jax.random.uniform(kb, (1, hidden_layers_size),
                               minval=-bound, maxval=bound, dtype=jnp.float32)
        params.append((w, b))
        in_dim = hidden_layers_size
    key, kw, kb = jax.random.split(key, 3)
    bound = 1.0 / jnp.sqrt(in_dim)
    w_out = jax.random.uniform(kw, (in_dim, 1),
                               minval=-bound, maxval=bound, dtype=jnp.float32)
    b_out = jax.random.uniform(kb, (1, 1),
                               minval=-bound, maxval=bound, dtype=jnp.float32)
    return params, (w_out, b_out)


def mlp_forward_ref(x, hidden_params, out_params):
    h = x
    for w, b in hidden_params:
        h = jnp.maximum(h @ w + b, 0.0)
    w_out, b_out = out_params
    return h @ w_out + b_out


if __name__ == "__main__":
    input_layer_size = 32
    n_hidden_layers = 2
    hidden_layers_size = 32
    batch = 8

    key = jax.random.PRNGKey(0)
    key, kx = jax.random.split(key)
    x = jax.random.normal(kx, (batch, input_layer_size), dtype=jnp.float32)

    hidden_params, out_params = init_mlp_params(
        key, input_layer_size, n_hidden_layers, hidden_layers_size
    )

    out = mlp_forward(x, hidden_params, out_params)
    out = jax.block_until_ready(out)

    ref = mlp_forward_ref(x, hidden_params, out_params)
    assert out.shape == (batch, 1), out.shape
    assert jnp.allclose(out, ref, atol=1e-5, rtol=1e-5), "mismatch vs reference"

    print("KERNEL_OK")
</pallas_src>

<mosaic_0001>
module attributes {stable_mosaic.version = 11 : i64} {
  func.func @_mlp_fused_kernel(%arg0: memref<8x128xf32, #tpu.memory_space<vmem>>, %arg1: memref<2x128x128xf32, #tpu.memory_space<vmem>>, %arg2: memref<2x1x128xf32, #tpu.memory_space<vmem>>, %arg3: memref<1x128xf32, #tpu.memory_space<vmem>>, %arg4: memref<1x1xf32, #tpu.memory_space<vmem>>, %arg5: memref<8x1xf32, #tpu.memory_space<vmem>>) attributes {dimension_semantics = [], scalar_prefetch = 0 : i64, scratch_operands = 0 : i64, tpu.core_type = #tpu.core_type<tc>} {
    %c0 = arith.constant 0 : index
    %c0_0 = arith.constant 0 : index
    %0 = vector.load %arg0[%c0, %c0_0] : memref<8x128xf32, #tpu.memory_space<vmem>>, vector<8x128xf32>
    %c0_1 = arith.constant 0 : index
    %c0_2 = arith.constant 0 : index
    %c0_3 = arith.constant 0 : index
    %1 = vector.load %arg1[%c0_1, %c0_2, %c0_3] : memref<2x128x128xf32, #tpu.memory_space<vmem>>, vector<1x128x128xf32>
    %2 = vector.shape_cast %1 : vector<1x128x128xf32> to vector<128x128xf32>
    %cst = arith.constant dense<0.000000e+00> : vector<8x128xf32>
    %3 = tpu.matmul %0, %2, %cst {dimension_numbers = #tpu.dot_dimension_numbers<[1], [0], [0], [1], [0, 0, 1, 1], [], []>} : vector<8x128xf32>, vector<128x128xf32>, vector<8x128xf32> -> vector<8x128xf32>
    %c0_4 = arith.constant 0 : index
    %c0_5 = arith.constant 0 : index
    %c0_6 = arith.constant 0 : index
    %4 = vector.load %arg2[%c0_4, %c0_5, %c0_6] : memref<2x1x128xf32, #tpu.memory_space<vmem>>, vector<1x1x128xf32>
    %5 = vector.shape_cast %4 : vector<1x1x128xf32> to vector<1x128xf32>
    %6 = vector.broadcast %5 : vector<1x128xf32> to vector<8x128xf32>
    %7 = arith.addf %3, %6 : vector<8x128xf32>
    %cst_7 = arith.constant 0.000000e+00 : f32
    %8 = vector.broadcast %cst_7 : f32 to vector<8x128xf32>
    %9 = arith.maximumf %7, %8 : vector<8x128xf32>
    %c1 = arith.constant 1 : index
    %c0_8 = arith.constant 0 : index
    %c0_9 = arith.constant 0 : index
    %10 = vector.load %arg1[%c1, %c0_8, %c0_9] : memref<2x128x128xf32, #tpu.memory_space<vmem>>, vector<1x128x128xf32>
    %11 = vector.shape_cast %10 : vector<1x128x128xf32> to vector<128x128xf32>
    %cst_10 = arith.constant dense<0.000000e+00> : vector<8x128xf32>
    %12 = tpu.matmul %9, %11, %cst_10 {dimension_numbers = #tpu.dot_dimension_numbers<[1], [0], [0], [1], [0, 0, 1, 1], [], []>} : vector<8x128xf32>, vector<128x128xf32>, vector<8x128xf32> -> vector<8x128xf32>
    %c1_11 = arith.constant 1 : index
    %c0_12 = arith.constant 0 : index
    %c0_13 = arith.constant 0 : index
    %13 = vector.load %arg2[%c1_11, %c0_12, %c0_13] : memref<2x1x128xf32, #tpu.memory_space<vmem>>, vector<1x1x128xf32>
    %14 = vector.shape_cast %13 : vector<1x1x128xf32> to vector<1x128xf32>
    %15 = vector.broadcast %14 : vector<1x128xf32> to vector<8x128xf32>
    %16 = arith.addf %12, %15 : vector<8x128xf32>
    %cst_14 = arith.constant 0.000000e+00 : f32
    %17 = vector.broadcast %cst_14 : f32 to vector<8x128xf32>
    %18 = arith.maximumf %16, %17 : vector<8x128xf32>
    %c0_15 = arith.constant 0 : index
    %c0_16 = arith.constant 0 : index
    %19 = vector.load %arg3[%c0_15, %c0_16] : memref<1x128xf32, #tpu.memory_space<vmem>>, vector<1x128xf32>
    %20 = vector.broadcast %19 : vector<1x128xf32> to vector<8x128xf32>
    %21 = arith.mulf %18, %20 : vector<8x128xf32>
    %cst_17 = arith.constant dense<0.000000e+00> : vector<8xf32>
    %22 = vector.multi_reduction <add>, %21, %cst_17 [1] : vector<8x128xf32> to vector<8xf32>
    %23 = vector.shape_cast %22 : vector<8xf32> to vector<8x1xf32>
    %c0_18 = arith.constant 0 : index
    %c0_19 = arith.constant 0 : index
    %24 = vector.load %arg4[%c0_18, %c0_19] : memref<1x1xf32, #tpu.memory_space<vmem>>, vector<1x1xf32>
    %25 = vector.broadcast %24 : vector<1x1xf32> to vector<8x1xf32>
    %26 = arith.addf %23, %25 : vector<8x1xf32>
    %c0_20 = arith.constant 0 : index
    %c0_21 = arith.constant 0 : index
    %27 = vector.load %arg5[%c0_20, %c0_21] : memref<8x1xf32, #tpu.memory_space<vmem>>, vector<8x1xf32>
    tpu.vector_store %arg5[%c0_20, %c0_21], %26 {strides = array<i32>} : memref<8x1xf32, #tpu.memory_space<vmem>>, vector<8x1xf32>,
    return
  }
}

</mosaic_0001>

<bundles_post_ra>
// kernel: tpu_custom_call.1
= control target key start
LH: loop header
LB: loop body
LE: loop exit
PB: predicated region body
PF: predicated region fallthrough
CT: control target
= control target key end

     0   :  { %s576_s0 = inlined_call_operand.hbm [shape: f32[8,128], index: 0, kind: input, shape index: {}]   ;;  %s577_s1 = inlined_call_operand.hbm [shape: f32[2,128,128], index: 1, kind: input, shape index: {}]   ;;  %s578_s2 = inlined_call_operand.vmem [shape: f32[2,1,128], index: 2, kind: input, shape index: {}]   ;;  %s579_s3 = inlined_call_operand.vmem [shape: f32[1,128], index: 3, kind: input, shape index: {}]   ;;  %s580_s4 = inlined_call_operand.<no memory space> [shape: f32[1,1], index: 4, kind: input, shape index: {}]   ;;  %s581_s5 = inlined_call_operand.vmem [shape: f32[8,1], index: 5, kind: output, shape index: {}]  }
   0x1   :  { %v10_v0 = vstv %s580_s4 }
   0x2   :  { %11 = vst [vmem:[#allocation2] sm:$0x1] %v10_v0 }
   0x3   :  { %12 = vsyncpa [#allocation4], 0 }
   0x4   :  { %13 = vsyncpa [#allocation6], 0  ;;  %s477_s20 = smov [#allocation3]   ;;  %s478_s22 = smov [#allocation5]  }
   0x5   :  { %s20_s21 = sshll.u32 %s477_s20, 4  ;;  %s29_s23 = sshll.u32 %s478_s22, 4  ;;  %s21_s21 = int_to_ptr.vmem [resolvable:$true] %s20_s21  ;;  %s517_s23 = int_to_ptr.vmem [resolvable:$true] %s29_s23 }
   0x6   :  { %s429_s26 = scalar_lea.hbm %s576_s0, 128 }
   0x7   :  { %p430_p0 = scmp.ne.s32.totalorder %s576_s0, %s429_s26  ;;  %p433_p1 = scmp.lt.u32.totalorder %s429_s26, %s576_s0 }
   0x9   :  { %p435_p2 = pnand %p433_p1, %p430_p0 }
   0xb   :  { %438 = shalt.err (!%p435_p2)
}
   0xc   :  { %s439_s30 = scalar_lea.vmem %s21_s21, 128  ;;  %p444_p4 = scmp.lt.s32.totalorder %s21_s21, %s21_s21 }
   0xd   :  { %p440_p3 = scmp.ne.s32.totalorder %s21_s21, %s439_s30  ;;  %p445_p5 = scmp.lt.s32.totalorder %s439_s30, %s439_s30 }
   0xf   :  { %p446_p6 = por %p445_p5, %p444_p4 }
  0x11   :  { %p447_p7 = pnand %p446_p6, %p440_p3 }
  0x13   :  { %450 = shalt.err (!%p447_p7)
}
  0x14   :  { %23 = dma.hbm_to_vmem [thread:$0]  %s576_s0, 128, %s21_s21, [#allocation4]  }
  0x15   :  { %s451_s10 = scalar_lea.hbm %s577_s1, 4096 }
  0x16   :  { %p452_p8 = scmp.ne.s32.totalorder %s577_s1, %s451_s10  ;;  %p455_p9 = scmp.lt.u32.totalorder %s451_s10, %s577_s1 }
  0x18   :  { %p457_p10 = pnand %p455_p9, %p452_p8 }
  0x1a   :  { %460 = shalt.err (!%p457_p10)
}
  0x1b   :  { %s461_s15 = scalar_lea.vmem %s517_s23, 4096  ;;  %p466_p12 = scmp.lt.s32.totalorder %s517_s23, %s517_s23 }
  0x1c   :  { %p462_p11 = scmp.ne.s32.totalorder %s517_s23, %s461_s15  ;;  %p467_p13 = scmp.lt.s32.totalorder %s461_s15, %s461_s15 }
  0x1e   :  { %p468_p0 = por %p467_p13, %p466_p12 }
  0x20   :  { %p469_p1 = pnand %p468_p0, %p462_p11 }
  0x22   :  { %472 = shalt.err (!%p469_p1)
}
  0x23   :  { %s479_s0 = smov 128   ;;  %s480_s16 = smov 8  }
  0x24   :  { %35 = dma.hbm_to_vmem [thread:$0]  %s577_s1, 4096, %s517_s23, [#allocation6], %s479_s0, %s479_s0, %s480_s16  }
  0x25   :  { %473 = dma.done.wait [#allocation4], 128  }
  0x26   :  { %474 = vsyncadd [#allocation4], 4294967168 }
  0x27   :  { %475 = dma.done.wait [#allocation6], 4096  }
  0x28   :  { %476 = vsyncadd [#allocation6], 4294963200  ;;  %v481_v1 = vmov 0.0|0.0   ;;  %vm482_vm0 = vmmov 0   ;;  %v483_v2 = vmov 0.0   ;;  %v49_v3 = vld [vmem:[#allocation5] sm:$0xff] }
  0x29   :  { %374 = vmatprep.subr.bf16.mxu0 %v481_v1  ;;  %336 = vmatprep.mubr.msk.f32.mxu0 %vm482_vm0, %v483_v2  ;;  %v50_v4 = vld [vmem:[#allocation5 + $0x8] sm:$0xff]  ;;  %v51_v5 = vld [vmem:[#allocation5 + $0x10] sm:$0xff]  ;;  %v52_v7 = vld [vmem:[#allocation5 + $0x18] sm:$0xff]  ;;  %vm257_vm1 = vcmask 7168  }
  0x2a   :  { %398 = vmatprep.subr.bf16.mxu1 %v481_v1  ;;  %371 = vmatprep.mubr.msk.f32.mxu1 %vm482_vm0, %v483_v2  ;;  %v375_v6 = vpack.c.bf16 %v50_v4, %v49_v3  ;;  %v378_v8 = vpack.c.bf16 %v52_v7, %v51_v5  ;;  %v53_v9 = vld [vmem:[#allocation5 + $0x20] sm:$0xff]  ;;  %v54_v10 = vld [vmem:[#allocation5 + $0x28] sm:$0xff]  ;;  %v146_v13 = vld [vmem:[#allocation5 + $0x90] sm:$0xff] }
  0x2b   :  { %v144_v11 = vld [vmem:[#allocation5 + $0x80] sm:$0xff]  ;;  %v145_v12 = vld [vmem:[#allocation5 + $0x88] sm:$0xff]  ;;  %v147_v14 = vld [vmem:[#allocation5 + $0x98] sm:$0xff]  ;;  %v381_v15 = vpack.c.bf16 %v54_v10, %v53_v9 }
  0x2c   :  { %376 = vmatpush3.bf16.msra.mxu0 %v375_v6  ;;  %v399_v16 = vpack.c.bf16 %v145_v12, %v144_v11  ;;  %v55_v17 = vld [vmem:[#allocation5 + $0x30] sm:$0xff]  ;;  %v56_v18 = vld [vmem:[#allocation5 + $0x38] sm:$0xff]  ;;  %v402_v19 = vpack.c.bf16 %v147_v14, %v146_v13  ;;  %v148_v20 = vld [vmem:[#allocation5 + $0xa0] sm:$0xff] }
  0x2d   :  { %377 = vmatprep.subr.bf16.mxu0 %v481_v1  ;;  %v149_v21 = vld [vmem:[#allocation5 + $0xa8] sm:$0xff]  ;;  %v384_v22 = vpack.c.bf16 %v56_v18, %v55_v17  ;;  %v57_v23 = vld [vmem:[#allocation5 + $0x40] sm:$0xff]  ;;  %v150_v26 = vld [vmem:[#allocation5 + $0xb0] sm:$0xff] }
  0x2e   :  { %400 = vmatpush3.bf16.msra.mxu1 %v399_v16  ;;  %v58_v24 = vld [vmem:[#allocation5 + $0x48] sm:$0xff]  ;;  %v405_v25 = vpack.c.bf16 %v149_v21, %v148_v20  ;;  %v151_v27 = vld [vmem:[#allocation5 + $0xb8] sm:$0xff]  ;;  %v59_v29 = vld [vmem:[#allocation5 + $0x50] sm:$0xff] }
  0x2f   :  { %401 = vmatprep.subr.bf16.mxu1 %v481_v1  ;;  %v387_v28 = vpack.c.bf16 %v58_v24, %v57_v23  ;;  %v60_v30 = vld [vmem:[#allocation5 + $0x58] sm:$0xff]  ;;  %v408_v31 = vpack.c.bf16 %v151_v27, %v150_v26  ;;  %v152_v32 = vld [vmem:[#allocation5 + $0xc0] sm:$0xff]  ;;  %v153_v33 = vld [vmem:[#allocation5 + $0xc8] sm:$0xff] }
  0x30   :  { %379 = vmatpush3.bf16.msra.mxu0 %v378_v8  ;;  %v390_v34 = vpack.c.bf16 %v60_v30, %v59_v29  ;;  %v61_v35 = vld [vmem:[#allocation5 + $0x60] sm:$0xff]  ;;  %v62_v36 = vld [vmem:[#allocation5 + $0x68] sm:$0xff]  ;;  %v411_v37 = vpack.c.bf16 %v153_v33, %v152_v32  ;;  %v154_v38 = vld [vmem:[#allocation5 + $0xd0] sm:$0xff] }
  0x31   :  { %380 = vmatprep.subr.bf16.mxu0 %v481_v1  ;;  %v155_v39 = vld [vmem:[#allocation5 + $0xd8] sm:$0xff]  ;;  %v393_v40 = vpack.c.bf16 %v62_v36, %v61_v35  ;;  %v63_v41 = vld [vmem:[#allocation5 + $0x70] sm:$0xff]  ;;  %v156_v44 = vld [vmem:[#allocation5 + $0xe0] sm:$0xff] }
  0x32   :  { %403 = vmatpush3.bf16.msra.mxu1 %v402_v19  ;;  %v64_v42 = vld [vmem:[#allocation5 + $0x78] sm:$0xff]  ;;  %v414_v43 = vpack.c.bf16 %v155_v39, %v154_v38  ;;  %v157_v45 = vld [vmem:[#allocation5 + $0xe8] sm:$0xff]  ;;  %v158_v49 = vld [vmem:[#allocation5 + $0xf0] sm:$0xff] }
  0x33   :  { %404 = vmatprep.subr.bf16.mxu1 %v481_v1  ;;  %v396_v46 = vpack.c.bf16 %v64_v42, %v63_v41  ;;  %v417_v47 = vpack.c.bf16 %v157_v45, %v156_v44  ;;  %v48_v48 = vld [vmem:[#allocation3] sm:$0xff]  ;;  %v265_v52 = vld [vmem:[%s578_s2] ss:$0 sm:$0xff] }
  0x34   :  { %382 = vmatpush3.bf16.msra.mxu0 %v381_v15  ;;  %v159_v50 = vld [vmem:[#allocation5 + $0xf8] sm:$0xff]  ;;  %v268_v61 = vld [vmem:[%s579_s3] ss:$0 sm:$0xff] }
  0x35   :  { %383 = vmatprep.subr.bf16.mxu0 %v481_v1  ;;  %v420_v51 = vpack.c.bf16 %v159_v50, %v158_v49  ;;  %v267_v57 = vld [vmem:[%s578_s2 + $0x1] ss:$0 sm:$0xff]  ;;  %v269_v0 = vld [vmem:[#allocation2] ss:$0 sm:$0xff] }
  0x36   :  { %406 = vmatpush3.bf16.msra.mxu1 %v405_v25 }
  0x37   :  { %407 = vmatprep.subr.bf16.mxu1 %v481_v1 }
  0x38   :  { %385 = vmatpush3.bf16.msra.mxu0 %v384_v22 }
  0x39   :  { %386 = vmatprep.subr.bf16.mxu0 %v481_v1 }
  0x3a   :  { %409 = vmatpush3.bf16.msra.mxu1 %v408_v31 }
  0x3b   :  { %410 = vmatprep.subr.bf16.mxu1 %v481_v1 }
  0x3c   :  { %388 = vmatpush3.bf16.msra.mxu0 %v387_v28 }
  0x3d   :  { %389 = vmatprep.subr.bf16.mxu0 %v481_v1 }
  0x3e   :  { %412 = vmatpush3.bf16.msra.mxu1 %v411_v37 }
  0x3f   :  { %413 = vmatprep.subr.bf16.mxu1 %v481_v1 }
  0x40   :  { %391 = vmatpush3.bf16.msra.mxu0 %v390_v34 }
  0x41   :  { %392 = vmatprep.subr.bf16.mxu0 %v481_v1 }
  0x42   :  { %415 = vmatpush3.bf16.msra.mxu1 %v414_v43 }
  0x43   :  { %416 = vmatprep.subr.bf16.mxu1 %v481_v1 }
  0x44   :  { %394 = vmatpush3.bf16.msra.mxu0 %v393_v40 }
  0x45   :  { %395 = vmatprep.subr.bf16.mxu0 %v481_v1 }
  0x46   :  { %418 = vmatpush3.bf16.msra.mxu1 %v417_v47 }
  0x47   :  { %419 = vmatprep.subr.bf16.mxu1 %v481_v1 }
  0x48   :  { %397 = vmatpush3.bf16.msra.mxu0 %v396_v46 }
  0x4a   :  { %421 = vmatpush3.bf16.msra.mxu1 %v420_v51 }
  0x4b   :  { %337 = vmatmul.mubr.f32.vlgmr.msra.gmra.mrb[0].mxu0 %v48_v48 }
 0x11e   :  { %v138_v53 = vpop.f32.mrb[0].mxu0 }
 0x11f   :  { %v139_v54 = vadd.f32 %v265_v52, %v138_v53  ;;  %v338_v55 = vpop.f32.mrb[1].mxu0 }
 0x121   :  { %v142_v56 = vmax.f32 %v139_v54, 0.0 }
 0x123   :  { %372 = vmatmul.mubr.f32.vlgmr.msra.gmra.mrb[0].mxu1 %v142_v56 }
 0x1f6   :  { %v234_v58 = vpop.f32.mrb[0].mxu1 }
 0x1f7   :  { %v235_v59 = vadd.f32 %v267_v57, %v234_v58  ;;  %v373_v60 = vpop.f32.mrb[1].mxu1 }
 0x1f9   :  { %v238_v62 = vmax.f32 %v235_v59, 0.0 }
 0x1fb   :  { %v246_v63 = vmul.f32 %v268_v61, %v238_v62 }
 0x1fd   :  { %247 = vadd.xlane.f32.xlu0 %v246_v63 }
 0x28a   :  { %v248_v1 = vpop.xlane.xlu0 %247 }
 0x28b   :  { %v256_v2 = vadd.f32 %v269_v0, %v248_v1 }
 0x28d   :  { %258 = vst.msk [vmem:[%s581_s5] sm:$0xff] %vm257_vm1, %v256_v2 }
 0x28e   :  { %263 = vsyncpa [#allocation4], 1 }
 0x28f   :  { %264 = vsyncpa [#allocation6], 1 }

</bundles_post_ra>
